<compile_context>
chip_gen: v7x
topology: tpu7x:2x2x1
jax: 0.10.0
libtpu: 0.0.40
codegen_flags: <defaults>
</compile_context>

<pallas_src>
import functools

import jax
import jax.numpy as jnp
from jax.experimental import pallas as pl
from jax.experimental.pallas import tpu as pltpu

LN_EPS = 1e-5  # PyTorch nn.LayerNorm default


def _round_up(x, m):
    return ((x + m - 1) // m) * m


def _vmem_policy():
    """(tile budget, vmem_limit_bytes), generation-aware.

    v5e/v6e have 128 MiB physical VMEM -> use most of it so large K*D configs
    keep tm=512; v7x has only 64 MiB -> stay conservative.
    """
    phys = None
    try:
        phys = getattr(pltpu.get_tpu_info(), "vmem_capacity_bytes", None)
    except Exception:
        phys = None
    if phys is not None and phys >= 96 * 1024 * 1024:
        return 96 * 1024 * 1024, 112 * 1024 * 1024   # v5e / v6e
    return 40 * 1024 * 1024, 48 * 1024 * 1024        # v7x or unknown


def _pick_tm(L, K, Dp, B, has_af, budget_bytes):
    """Largest 16-multiple row tile <= 512 whose working set fits the budget.

    Invariant operands (weight, gamma, beta) are single-buffered -> counted
    once; streamed tiles (patches, pos, af, out) are double-buffered bf16.
    """
    cap = min(512, _round_up(max(L, 16), 16))
    tm = 16
    for cand in (512, 384, 256, 128, 64, 32, 16):
        if cand > cap:
            continue
        ws = (K * Dp * 2                  # weight (bf16), single-buffered
              + 2 * Dp * 4                # gamma + beta (f32), single-buffered
              + 2 * cand * K * 2          # patches tile (bf16), double-buffered
              + 2 * cand * Dp * 2         # pos tile (bf16), double-buffered
              + 2 * cand * Dp * 2)        # output tile (bf16), double-buffered
        if has_af:
            ws += 2 * cand * Dp * 2       # additional-features tile (bf16)
        if ws <= budget_bytes:
            tm = cand
            break
    # Keep >= 2 total grid steps so v7x's second TensorCore has work.
    # This adjustment only ever SHRINKS tm, so the working set only shrinks.
    if B * (_round_up(L, tm) // tm) < 2 and L > 16:
        tm = max(16, _round_up((L + 1) // 2, 16))
    return tm


def _single_buffered(block_shape, index_map):
    """BlockSpec for a grid-invariant operand: no double-buffering (VMEM win).

    Falls back to a plain BlockSpec on JAX versions without pipeline_mode.
    """
    try:
        return pl.BlockSpec(block_shape, index_map,
                            pipeline_mode=pl.Buffered(buffer_count=1))
    except Exception:
        return pl.BlockSpec(block_shape, index_map)


# ----------------------------------------------------------------------------
# Pallas kernel: fused (patches @ W + pos+bias [+ af]) -> LayerNorm(gamma,beta)
# ----------------------------------------------------------------------------
def _patch_embed_kernel(p_ref, w_ref, pos_ref, *rest, inv_d):
    # p_ref:   (1, tm, K)   bf16 unfolded patches tile
    # w_ref:   (K, Dp)      bf16 conv weight as matmul (cols zero-padded to Dp)
    # pos_ref: (1, tm, Dp)  bf16 pos-enc + conv bias (shared across batch)
    # [af_ref: (1, tm, Dp)  bf16 additional features (per-batch), optional]
    # g_ref:   (1, Dp)      f32  LayerNorm weight (0 in padded lanes)
    # b_ref:   (1, Dp)      f32  LayerNorm bias   (0 in padded lanes)
    # o_ref:   (1, tm, Dp)  bf16 output tokens
    if len(rest) == 4:
        af_ref, g_ref, beta_ref, o_ref = rest
    else:
        af_ref = None
        g_ref, beta_ref, o_ref = rest

    y = jnp.dot(p_ref[0], w_ref[...], preferred_element_type=jnp.float32)
    y = y + pos_ref[0].astype(jnp.float32)          # f32 add (VPU slack)
    if af_ref is not None:
        y = y + af_ref[0].astype(jnp.float32)

    # One-pass LayerNorm over the true (unpadded) D; padded lanes of y are
    # exactly 0 (zero weight cols / zero pos & af padding) so they contribute
    # nothing to the sums, and gamma/beta padding zeroes them in the output.
    mean = jnp.sum(y, axis=-1, keepdims=True) * inv_d
    var = jnp.sum(y * y, axis=-1, keepdims=True) * inv_d - mean * mean
    y = (y - mean) * jax.lax.rsqrt(var + LN_EPS)
    o_ref[0] = (y * g_ref[...] + beta_ref[...]).astype(o_ref.dtype)


def _fused_patch_embed(patches, w, pos, af, gamma, beta, *, tm, true_d,
                       out_dtype, vmem_limit_bytes):
    B, Lp, K = patches.shape
    Dp = w.shape[1]
    assert Lp % tm == 0

    kernel = functools.partial(_patch_embed_kernel, inv_d=1.0 / float(true_d))

    in_specs = [
        pl.BlockSpec((1, tm, K), lambda i, b: (b, i, 0)),     # patches
        _single_buffered((K, Dp), lambda i, b: (0, 0)),       # weight (invariant)
        pl.BlockSpec((1, tm, Dp), lambda i, b: (0, i, 0)),    # pos (batch-invariant)
    ]
    operands = [patches, w, pos]
    if af is not None:
        in_specs.append(pl.BlockSpec((1, tm, Dp), lambda i, b: (b, i, 0)))
        operands.append(af)
    in_specs += [
        _single_buffered((1, Dp), lambda i, b: (0, 0)),       # LN gamma
        _single_buffered((1, Dp), lambda i, b: (0, 0)),       # LN beta
    ]
    operands += [gamma, beta]

    # Advisory cost: pos counted once (its DMA is skipped across batch).
    bytes_accessed = (patches.size * 2 + w.size * 2 + pos.size * 2
                      + (af.size * 2 if af is not None else 0)
                      + 2 * Dp * 4 + B * Lp * Dp * 2)
    cost = pl.CostEstimate(flops=2 * B * Lp * K * Dp, transcendentals=0,
                           bytes_accessed=int(bytes_accessed))

    return pl.pallas_call(
        kernel,
        out_shape=jax.ShapeDtypeStruct((B, Lp, Dp), out_dtype),
        grid_spec=pltpu.PrefetchScalarGridSpec(
            num_scalar_prefetch=0,
            grid=(Lp // tm, B),          # row-tiles outer, batch inner
            in_specs=in_specs,
            out_specs=pl.BlockSpec((1, tm, Dp), lambda i, b: (b, i, 0)),
        ),
        compiler_params=pltpu.CompilerParams(
            dimension_semantics=("parallel", "parallel"),
            vmem_limit_bytes=vmem_limit_bytes,
        ),
        cost_estimate=cost,
    )(*operands)


# ----------------------------------------------------------------------------
# Module wrapper (glue in plain JAX, hot path in Pallas)
# ----------------------------------------------------------------------------
class PatchEmbed2dPallas:
    def __init__(self, in_channels, embed_dim, patch_size, key,
                 compute_dtype=jnp.bfloat16):
        self.in_channels = in_channels
        self.embed_dim = embed_dim
        self.patch_size = tuple(patch_size)
        self.compute_dtype = compute_dtype
        ph, pw = self.patch_size
        K = in_channels * ph * pw

        ks = jax.random.split(key, 4)
        scale = 0.02
        # Conv2d(in_channels, embed_dim, patch_size, stride=patch_size)
        # weight (D, C, ph, pw) -> matmul weight (K, D) with K = C*ph*pw.
        conv_w = scale * jax.random.normal(
            ks[0], (embed_dim, in_channels, ph, pw), jnp.float32)
        self.conv_w_mat = conv_w.reshape(embed_dim, K).T             # (K, D) f32
        self.conv_b = scale * jax.random.normal(ks[1], (embed_dim,), jnp.float32)
        # RelativeFactorizedPosition(2, embed_dim) MLP params.
        self.pos_w1 = scale * jax.random.normal(ks[2], (2, embed_dim), jnp.float32)
        self.pos_b1 = jnp.zeros((embed_dim,), jnp.float32)
        self.pos_w2 = scale * jax.random.normal(ks[3], (embed_dim, embed_dim),
                                                jnp.float32)
        self.pos_b2 = jnp.zeros((embed_dim,), jnp.float32)
        # LayerNorm(embed_dim)
        self.ln_gamma = jnp.ones((embed_dim,), jnp.float32)
        self.ln_beta = jnp.zeros((embed_dim,), jnp.float32)

        # Kernel-ready params: D padded to a lane-dense multiple of 128, K left
        # unpadded (blocks take the full K dim), weight cast to bf16 once.
        self.K = K
        self.Dp = _round_up(embed_dim, 128)
        w_pad = jnp.zeros((K, self.Dp), jnp.float32)
        w_pad = w_pad.at[:, :embed_dim].set(self.conv_w_mat)
        self._w_pad = w_pad.astype(compute_dtype)                    # (K, Dp) bf16
        self._gamma_pad = jnp.zeros((1, self.Dp), jnp.float32
                                    ).at[0, :embed_dim].set(self.ln_gamma)
        self._beta_pad = jnp.zeros((1, self.Dp), jnp.float32
                                   ).at[0, :embed_dim].set(self.ln_beta)
        self._pos_cache = {}

    def tokenized_size(self, size):
        return tuple(s // p for s, p in zip(size, self.patch_size))

    def _pos_encoding(self, dims):
        ht, wt = dims
        ys = jnp.linspace(-1.0, 1.0, ht, dtype=jnp.float32)
        xs = jnp.linspace(-1.0, 1.0, wt, dtype=jnp.float32)
        gy, gx = jnp.meshgrid(ys, xs, indexing="ij")
        grid = jnp.stack([gy.reshape(-1), gx.reshape(-1)], axis=-1)  # (L, 2)
        h = jax.nn.gelu(grid @ self.pos_w1 + self.pos_b1)
        return h @ self.pos_w2 + self.pos_b2                         # (L, D) f32

    def _pos_bias(self, dims):
        # pos-enc + conv bias, padded to Dp, cast to bf16; cached per (ht, wt)
        # so the tiny MLP is not re-run every call.
        if dims not in self._pos_cache:
            posb = self._pos_encoding(dims) + self.conv_b            # (L, D) f32
            if self.Dp != self.embed_dim:
                posb = jnp.pad(posb, ((0, 0), (0, self.Dp - self.embed_dim)))
            self._pos_cache[dims] = posb.astype(self.compute_dtype)[None]
        return self._pos_cache[dims]                                 # (1, L, Dp)

    def _unfold(self, x):
        # x: (B, C, H, W) NCHW -> (B, L, C*ph*pw), patch-inner order (C, ph, pw)
        B, C, H, W = x.shape
        ph, pw = self.patch_size
        ht, wt = H // ph, W // pw
        x = x.reshape(B, C, ht, ph, wt, pw)
        x = x.transpose(0, 2, 4, 1, 3, 5)          # (B, ht, wt, C, ph, pw)
        return x.reshape(B, ht * wt, C * ph * pw)

    def __call__(self, x, additional_features=None):
        B, C, H, W = x.shape
        ht, wt = self.tokenized_size((H, W))
        L = ht * wt
        D = self.embed_dim
        K = self.K
        Dp = self.Dp
        has_af = additional_features is not None

        budget, vmem_limit = _vmem_policy()
        tm = _pick_tm(L, K, Dp, B, has_af, budget)
        Lp = _round_up(L, tm)

        # bf16 cast BEFORE the unfold so the relayout copy is written in bf16.
        patches = self._unfold(x.astype(self.compute_dtype))         # (B, L, K)
        if Lp != L:
            patches = jnp.pad(patches, ((0, 0), (0, Lp - L), (0, 0)))

        posb = self._pos_bias((ht, wt))                              # (1, L, Dp)
        if Lp != L:
            posb = jnp.pad(posb, ((0, 0), (0, Lp - L), (0, 0)))

        af = None
        if has_af:
            af = additional_features.astype(self.compute_dtype)      # (B, L, D)
            if Lp != L or Dp != D:
                af = jnp.pad(af, ((0, 0), (0, Lp - L), (0, Dp - D)))

        y = _fused_patch_embed(patches, self._w_pad, posb, af,
                               self._gamma_pad, self._beta_pad,
                               tm=tm, true_d=D,
                               out_dtype=self.compute_dtype,
                               vmem_limit_bytes=vmem_limit)
        return y[:, :L, :D]

    # Plain-JAX reference (PyTorch semantics); optionally mirrors the kernel's
    # bf16 input rounding so the residual error is just the bf16 output store.
    # TODO(synk): kernel uses one-pass f32 variance; switch to a two-pass form
    # if trained embeddings with large means ever stress cancellation.
    def reference(self, x, additional_features=None, match_compute_dtype=True):
        B, C, H, W = x.shape
        ht, wt = self.tokenized_size((H, W))
        patches = self._unfold(x)                                     # (B, L, K)
        w = self.conv_w_mat
        posb = self._pos_encoding((ht, wt)) + self.conv_b             # (L, D)
        af = additional_features
        if match_compute_dtype:
            cd = self.compute_dtype
            patches = patches.astype(cd).astype(jnp.float32)
            w = w.astype(cd).astype(jnp.float32)
            posb = posb.astype(cd).astype(jnp.float32)
            if af is not None:
                af = af.astype(cd).astype(jnp.float32)
        y = jnp.einsum("blk,kd->bld", patches, w,
                       precision=jax.lax.Precision.HIGHEST)
        y = y + posb[None]
        if af is not None:
            y = y + af
        mean = jnp.mean(y, axis=-1, keepdims=True)
        var = jnp.mean((y - mean) ** 2, axis=-1, keepdims=True)
        y = (y - mean) * jax.lax.rsqrt(var + LN_EPS)
        return y * self.ln_gamma + self.ln_beta


if __name__ == "__main__":
    key = jax.random.PRNGKey(0)
    k_param, k_x, k_af = jax.random.split(key, 3)

    B, C, H, W = 2, 4, 16, 16
    embed_dim = 32
    patch_size = (4, 4)
    L = (H // patch_size[0]) * (W // patch_size[1])

    module = PatchEmbed2dPallas(C, embed_dim, patch_size, k_param)
    x = jax.random.normal(k_x, (B, C, H, W), jnp.float32)

    # Path 1: no additional features.
    out = jax.block_until_ready(module(x))
    ref = module.reference(x)
    assert out.shape == (B, L, embed_dim), out.shape
    assert out.dtype == module.compute_dtype, out.dtype
    assert jnp.allclose(out.astype(jnp.float32), ref, atol=2e-2, rtol=2e-2), (
        float(jnp.max(jnp.abs(out.astype(jnp.float32) - ref))))

    # Path 2: with additional features (separate per-batch bf16 stream).
    af = 0.1 * jax.random.normal(k_af, (B, L, embed_dim), jnp.float32)
    out2 = jax.block_until_ready(module(x, af))
    ref2 = module.reference(x, af)
    assert jnp.allclose(out2.astype(jnp.float32), ref2, atol=2e-2, rtol=2e-2), (
        float(jnp.max(jnp.abs(out2.astype(jnp.float32) - ref2))))

    print("KERNEL_OK")
</pallas_src>

<mosaic_0001>
module attributes {stable_mosaic.version = 11 : i64} {
  func.func @_patch_embed_kernel(%arg0: i32, %arg1: i32, %arg2: memref<1x16x64xbf16, #tpu.memory_space<vmem>>, %arg3: memref<64x128xbf16, #tpu.memory_space<vmem>>, %arg4: memref<1x16x128xbf16, #tpu.memory_space<vmem>>, %arg5: memref<1x128xf32, #tpu.memory_space<vmem>>, %arg6: memref<1x128xf32, #tpu.memory_space<vmem>>, %arg7: memref<1x16x128xbf16, #tpu.memory_space<vmem>>) attributes {dimension_semantics = [#tpu.dimension_semantics<parallel>, #tpu.dimension_semantics<parallel>], iteration_bounds = array<i64: 1, 2>, scalar_prefetch = 0 : i64, scratch_operands = 0 : i64, tpu.core_type = #tpu.core_type<tc>, window_params = [{transform_indices = @transform_0, window_bounds = array<i64: 1, 16, 64>}, {pipeline_mode = #tpu.pipeline_mode<synchronous>, transform_indices = @transform_1, window_bounds = array<i64: 64, 128>}, {transform_indices = @transform_2, window_bounds = array<i64: 1, 16, 128>}, {pipeline_mode = #tpu.pipeline_mode<synchronous>, transform_indices = @transform_3, window_bounds = array<i64: 1, 128>}, {pipeline_mode = #tpu.pipeline_mode<synchronous>, transform_indices = @transform_4, window_bounds = array<i64: 1, 128>}, {transform_indices = @transform_5, window_bounds = array<i64: 1, 16, 128>}]} {
    %c0 = arith.constant 0 : index
    %c0_0 = arith.constant 0 : index
    %c0_1 = arith.constant 0 : index
    %0 = vector.load %arg2[%c0, %c0_0, %c0_1] : memref<1x16x64xbf16, #tpu.memory_space<vmem>>, vector<1x16x64xbf16>
    %1 = vector.shape_cast %0 : vector<1x16x64xbf16> to vector<16x64xbf16>
    %c0_2 = arith.constant 0 : index
    %c0_3 = arith.constant 0 : index
    %2 = vector.load %arg3[%c0_2, %c0_3] : memref<64x128xbf16, #tpu.memory_space<vmem>>, vector<64x128xbf16>
    %cst = arith.constant dense<0.000000e+00> : vector<16x128xf32>
    %3 = tpu.matmul %1, %2, %cst {dimension_numbers = #tpu.dot_dimension_numbers<[1], [0], [0], [1], [0, 0, 1, 1], [], []>} : vector<16x64xbf16>, vector<64x128xbf16>, vector<16x128xf32> -> vector<16x128xf32>
    %c0_4 = arith.constant 0 : index
    %c0_5 = arith.constant 0 : index
    %c0_6 = arith.constant 0 : index
    %4 = vector.load %arg4[%c0_4, %c0_5, %c0_6] : memref<1x16x128xbf16, #tpu.memory_space<vmem>>, vector<1x16x128xbf16>
    %5 = vector.shape_cast %4 : vector<1x16x128xbf16> to vector<16x128xbf16>
    %6 = arith.extf %5 : vector<16x128xbf16> to vector<16x128xf32>
    %7 = arith.addf %3, %6 : vector<16x128xf32>
    %cst_7 = arith.constant dense<0.000000e+00> : vector<16xf32>
    %8 = vector.multi_reduction <add>, %7, %cst_7 [1] : vector<16x128xf32> to vector<16xf32>
    %9 = vector.shape_cast %8 : vector<16xf32> to vector<16x1xf32>
    %cst_8 = arith.constant 3.125000e-02 : f32
    %10 = vector.broadcast %cst_8 : f32 to vector<16x1xf32>
    %11 = arith.mulf %9, %10 : vector<16x1xf32>
    %12 = arith.mulf %7, %7 : vector<16x128xf32>
    %cst_9 = arith.constant dense<0.000000e+00> : vector<16xf32>
    %13 = vector.multi_reduction <add>, %12, %cst_9 [1] : vector<16x128xf32> to vector<16xf32>
    %14 = vector.shape_cast %13 : vector<16xf32> to vector<16x1xf32>
    %cst_10 = arith.constant 3.125000e-02 : f32
    %15 = vector.broadcast %cst_10 : f32 to vector<16x1xf32>
    %16 = arith.mulf %14, %15 : vector<16x1xf32>
    %17 = arith.mulf %11, %11 : vector<16x1xf32>
    %18 = arith.subf %16, %17 : vector<16x1xf32>
    %19 = vector.broadcast %11 : vector<16x1xf32> to vector<16x128xf32>
    %20 = arith.subf %7, %19 : vector<16x128xf32>
    %cst_11 = arith.constant 9.99999974E-6 : f32
    %21 = vector.broadcast %cst_11 : f32 to vector<16x1xf32>
    %22 = arith.addf %18, %21 : vector<16x1xf32>
    %23 = math.rsqrt %22 : vector<16x1xf32>
    %24 = vector.broadcast %23 : vector<16x1xf32> to vector<16x128xf32>
    %25 = arith.mulf %20, %24 : vector<16x128xf32>
    %c0_12 = arith.constant 0 : index
    %c0_13 = arith.constant 0 : index
    %26 = vector.load %arg5[%c0_12, %c0_13] : memref<1x128xf32, #tpu.memory_space<vmem>>, vector<1x128xf32>
    %27 = vector.broadcast %26 : vector<1x128xf32> to vector<16x128xf32>
    %28 = arith.mulf %25, %27 : vector<16x128xf32>
    %c0_14 = arith.constant 0 : index
    %c0_15 = arith.constant 0 : index
    %29 = vector.load %arg6[%c0_14, %c0_15] : memref<1x128xf32, #tpu.memory_space<vmem>>, vector<1x128xf32>
    %30 = vector.broadcast %29 : vector<1x128xf32> to vector<16x128xf32>
    %31 = arith.addf %28, %30 : vector<16x128xf32>
    %32 = arith.truncf %31 : vector<16x128xf32> to vector<16x128xbf16>
    %c0_16 = arith.constant 0 : index
    %c0_17 = arith.constant 0 : index
    %c0_18 = arith.constant 0 : index
    %33 = vector.load %arg7[%c0_16, %c0_17, %c0_18] : memref<1x16x128xbf16, #tpu.memory_space<vmem>>, vector<1x16x128xbf16>
    %34 = vector.shape_cast %33 : vector<1x16x128xbf16> to vector<16x128xbf16>
    %35 = vector.shape_cast %32 : vector<16x128xbf16> to vector<1x16x128xbf16>
    tpu.vector_store %arg7[%c0_16, %c0_17, %c0_18], %35 {strides = array<i32>} : memref<1x16x128xbf16, #tpu.memory_space<vmem>>, vector<1x16x128xbf16>,
    return
  }
  func.func @transform_0(%arg0: i32, %arg1: i32) -> (i32, i32, i32) {
    %c0_i32 = arith.constant 0 : i32
    %c0_i32_0 = arith.constant 0 : i32
    return %arg1, %arg0, %c0_i32 : i32, i32, i32
  }
  func.func @transform_1(%arg0: i32, %arg1: i32) -> (i32, i32) {
    %c0_i32 = arith.constant 0 : i32
    %c0_i32_0 = arith.constant 0 : i32
    %c0_i32_1 = arith.constant 0 : i32
    return %c0_i32, %c0_i32_0 : i32, i32
  }
  func.func @transform_2(%arg0: i32, %arg1: i32) -> (i32, i32, i32) {
    %c0_i32 = arith.constant 0 : i32
    %c0_i32_0 = arith.constant 0 : i32
    %c0_i32_1 = arith.constant 0 : i32
    return %c0_i32, %arg0, %c0_i32_0 : i32, i32, i32
  }
  func.func @transform_3(%arg0: i32, %arg1: i32) -> (i32, i32) {
    %c0_i32 = arith.constant 0 : i32
    %c0_i32_0 = arith.constant 0 : i32
    %c0_i32_1 = arith.constant 0 : i32
    return %c0_i32, %c0_i32_0 : i32, i32
  }
  func.func @transform_4(%arg0: i32, %arg1: i32) -> (i32, i32) {
    %c0_i32 = arith.constant 0 : i32
    %c0_i32_0 = arith.constant 0 : i32
    %c0_i32_1 = arith.constant 0 : i32
    return %c0_i32, %c0_i32_0 : i32, i32
  }
  func.func @transform_5(%arg0: i32, %arg1: i32) -> (i32, i32, i32) {
    %c0_i32 = arith.constant 0 : i32
    %c0_i32_0 = arith.constant 0 : i32
    return %arg1, %arg0, %c0_i32 : i32, i32, i32
  }
}

</mosaic_0001>

<bundles_post_ra>
// kernel: tpu_custom_call.1
= control target key start
LH: loop header
LB: loop body
LE: loop exit
PB: predicated region body
PF: predicated region fallthrough
CT: control target
= control target key end

     0   :  { %10 = vsyncpa [#allocation3], 0  ;;  %s1213_s0 = inlined_call_operand.hbm [shape: bf16[2,16,64], index: 0, kind: input, shape index: {}]   ;;  %s1214_s1 = inlined_call_operand.hbm [shape: bf16[64,128], index: 1, kind: input, shape index: {}]   ;;  %s1215_s2 = inlined_call_operand.hbm [shape: bf16[1,16,128], index: 2, kind: input, shape index: {}]   ;;  %s1216_s3 = inlined_call_operand.vmem [shape: f32[1,128], index: 3, kind: input, shape index: {}]   ;;  %s1217_s4 = inlined_call_operand.vmem [shape: f32[1,128], index: 4, kind: input, shape index: {}]   ;;  %s1218_s5 = inlined_call_operand.hbm [shape: bf16[2,16,128], index: 5, kind: output, shape index: {}]  }
   0x1   :  { %12 = vsyncpa [#allocation3 + $0x1], 0 }
   0x2   :  { %13 = vsyncpa [#allocation6], 0 }
   0x3   :  { %14 = vsyncpa [#allocation4], 0 }
   0x4   :  { %16 = vsyncpa [#allocation4 + $0x1], 0  ;;  %s939_s18 = smov 0   ;;  %s941_s19 = smov 0  }
   0x5   :  { %s943_s20 = smov 0   ;;  %s945_s21 = smov 0  }
   0x6   :  { %s947_s22 = smov 0   ;;  %s949_s23 = smov 0  }
   0x7 LB: > { %s568_s24 = sadd.s32 4294967295, %s897_s23   ;;  %s569_s25 = sadd.s32 4294967294, %s897_s23   ;;  %s897_s23 = sphi %s949_s23, %s22_s23   ;;  %s893_s22 = sphi %s947_s22, %s1242_s22   ;;  %s889_s21 = sphi %s945_s21, %s1241_s21   ;;  %s885_s20 = sphi %s943_s20, %s1240_s20   ;;  %s881_s19 = sphi %s941_s19, %s1239_s19   ;;  %s877_s18 = sphi %s939_s18, %s1238_s18  }
   0x8   : > { %p56_p0 = scmp.ne.s32.totalorder %s881_s19, %s877_s18  ;;  %p973_p1 = scmp.eq.s32.totalorder %s568_s24, 0 }
   0x9   : > { %p977_p2 = scmp.eq.s32.totalorder %s568_s24, 1  ;;  %p177_p3 = scmp.eq.s32.totalorder %s569_s25, 1 }
   0xa   : > { %s1224_s26 = scalar_select %p973_p1, 1, 0 }
   0xb   : > { %p983_p4 = por %p973_p1, %p56_p0  ;;  %p570_p5 = scmp.ge.s32.totalorder %s897_s23, 1 }
   0xc   : > { %p988_p6 = por %p177_p3, %p56_p0  ;;  %p184_p7 = scmp.lt.s32.totalorder %s897_s23, 3 }
   0xd   : > { %s1226_s28 = scalar_select %p983_p4, 1, 0 }
   0xe   : > { %s1227_s29 = scalar_select %p988_p6, 1, 0 }
   0xf   : > { %p993_p8 = pnand %p570_p5, %p184_p7  ;;  %s899_s6 = smov [#allocation5]  }
  0x10   : > { %s196_s7 = sshll.u32 %s899_s6, 4  ;;  %s900_s9 = smov [#allocation7]   ;;  %s997_s7 = int_to_ptr.vmem [resolvable:$true] %s196_s7 }
  0x11   : > { %p639_p9 = pneg %p993_p8  ;;  %s212_s10 = sshll.u32 %s900_s9, 4  ;;  %s1008_s10 = int_to_ptr.vmem [resolvable:$true] %s212_s10 }
  0x12   : > { %s725_s13 = scalar_lea.hbm %s1214_s1, 512 }
  0x13   : > { %p1004_p11 = pnand %p639_p9, %p973_p1  ;;  %p726_p12 = scmp.ne.s32.totalorder %s1214_s1, %s725_s13 }
  0x14   : > { %p732_p5 = scmp.lt.u32.totalorder %s725_s13, %s1214_s1 }
  0x15   : > { %p727_p13 = pneg %p1004_p11 }
  0x17   : > { %p728_p0 = pnand %p727_p13, %p726_p12 }
  0x19   : > { %p729_p3 = pneg %p728_p0 }
  0x1b   : > { %p734_p7 = pnand %p732_p5, %p729_p3 }
  0x1d   : > { %737 = shalt.err (!%p734_p7)
}
  0x1e   : > { %s738_s24 = scalar_lea.vmem %s997_s7, 512  ;;  %p746_p1 = scmp.lt.s32.totalorder %s997_s7, %s997_s7 }
  0x1f   : > { %p739_p9 = scmp.ne.s32.totalorder %s997_s7, %s738_s24  ;;  %p747_p12 = scmp.lt.s32.totalorder %s738_s24, %s738_s24 }
  0x21   : > { %p741_p10 = pnand %p739_p9, %p727_p13  ;;  %p748_p0 = por %p747_p12, %p746_p1 }
  0x23   : > { %p742_p6 = pneg %p741_p10 }
  0x25   : > { %p749_p4 = pnand %p748_p0, %p742_p6 }
  0x27   : > { %752 = shalt.err (!%p749_p4)
}
  0x28   : > { %s1222_s25 = smov 64   ;;  %s902_s6 = smov 4  }
  0x29   : > { %642 = dma.hbm_to_vmem [thread:$0]  (!%p1004_p11), %s1214_s1, 512, %s997_s7, [#allocation6], %s1222_s25, %s1222_s25, %s902_s6  }
  0x2a   : > { %s753_s14 = scalar_lea.hbm %s1215_s2, 128 }
  0x2b   : > { %p754_p1 = scmp.ne.s32.totalorder %s1215_s2, %s753_s14  ;;  %p760_p10 = scmp.lt.u32.totalorder %s753_s14, %s1215_s2 }
  0x2d   : > { %p756_p4 = pnand %p754_p1, %p727_p13 }
  0x2f   : > { %p757_p6 = pneg %p756_p4 }
  0x31   : > { %p762_p3 = pnand %p760_p10, %p757_p6 }
  0x33   : > { %765 = shalt.err (!%p762_p3)
}
  0x34   : > { %s766_s7 = scalar_lea.vmem %s1008_s10, 128  ;;  %p774_p12 = scmp.lt.s32.totalorder %s1008_s10, %s1008_s10 }
  0x35   : > { %p767_p5 = scmp.ne.s32.totalorder %s1008_s10, %s766_s7  ;;  %p775_p0 = scmp.lt.s32.totalorder %s766_s7, %s766_s7 }
  0x37   : > { %p769_p7 = pnand %p767_p5, %p727_p13  ;;  %p776_p1 = por %p775_p0, %p774_p12 }
  0x39   : > { %p770_p9 = pneg %p769_p7 }
  0x3b   : > { %p777_p4 = pnand %p776_p1, %p770_p9 }
  0x3d   : > { %780 = shalt.err (!%p777_p4)
}
  0x3e   : > { %645 = dma.hbm_to_vmem [thread:$0]  (!%p1004_p11), %s1215_s2, 128, %s1008_s10, [#allocation6], %s1222_s25, %s1222_s25, %s902_s6  }
  0x3f   : > { %s31_s8 = sadd.s32 1, %s893_s22  ;;  %s43_s12 = sadd.s32 1, %s885_s20 }
  0x40   : > { %p32_p13 = scmp.ge.s32.totalorder %s31_s8, 2  ;;  %p50_p6 = scmp.ne.s32.totalorder %s885_s20, %s881_s19 }
  0x41   : > { %p51_p10 = scmp.eq.s32.totalorder %s897_s23, 0  ;;  %p656_p3 = scmp.lt.s32.totalorder %s897_s23, 2 }
  0x42   : > { %s1244_s8 = smov (%p32_p13, %s31_s8), 0  ;;  %p1078_p7 = por %p977_p2, %p50_p6 }
  0x43   : > { %p52_p5 = por %p51_p10, %p50_p6  ;;  %s38_s14 = ssub.s32 %s893_s22, %s1244_s8 }
  0x44   : > { %s1230_s13 = scalar_select %p1078_p7, 1, 0 }
  0x45   : > { %s232_s15 = sand.u32 1, %s885_s20   ;;  %p41_p9 = scmp.eq.s32.totalorder %s38_s14, 0 }
  0x46   : > { %s574_s10 = sshll.u32 %s232_s15, 3  ;;  %s597_s16 = sshll.u32 %s893_s22, 7 }
  0x47   : > { %s1087_s17 = scalar_select %p41_p9, %s885_s20, %s43_s12  }
  0x48   : > { %s1092_s9 = scalar_lea.hbm %s1213_s0, %s597_s16  ;;  %s236_s27 = scalar_lea.vmem [#allocation2], %s574_s10 }
  0x49   : > { %s245_s11 = sshll.u32 %s236_s27, 4  ;;  %p1096_p2 = pnand %p656_p3, %p52_p5  ;;  %s1100_s11 = int_to_ptr.vmem [resolvable:$true] %s245_s11 }
  0x4a   : > { %s1102_s12 = scalar_lea.sflag [#allocation3], %s232_s15  ;;  %s781_s14 = scalar_lea.hbm %s1092_s9, 128 }
  0x4b   : > { %p782_p11 = scmp.ne.s32.totalorder %s1092_s9, %s781_s14  ;;  %p783_p12 = pneg %p1096_p2 }
  0x4c   : > { %s786_s24 = scalar_lea.hbm %s1213_s0, 256  ;;  %p787_p4 = scmp.lt.u32.totalorder %s1092_s9, %s1213_s0 }
  0x4d   : > { %p784_p0 = pnand %p783_p12, %p782_p11  ;;  %p788_p13 = scmp.lt.u32.totalorder %s786_s24, %s781_s14 }
  0x4e   : > { %p790_p10 = scmp.lt.u32.totalorder %s781_s14, %s1092_s9 }
  0x4f   : > { %p785_p1 = pneg %p784_p0  ;;  %p789_p6 = por %p788_p13, %p787_p4 }
  0x51   : > { %p791_p3 = por %p790_p10, %p789_p6 }
  0x53   : > { %p792_p5 = pnand %p791_p3, %p785_p1 }
  0x55   : > { %795 = shalt.err (!%p792_p5)
}
  0x56   : > { %s796_s15 = scalar_lea.vmem %s1100_s11, 128  ;;  %s903_s10 = smov [#allocation2]  }
  0x57   : > { %p797_p9 = scmp.ne.s32.totalorder %s1100_s11, %s796_s15  ;;  %s801_s16 = sshll.u32 %s903_s10, 4  ;;  %s802_s16 = int_to_ptr.vmem [resolvable:$false] %s801_s16 }
  0x58   : > { %s803_s7 = scalar_lea.vmem %s802_s16, 256  ;;  %p804_p7 = scmp.lt.s32.totalorder %s1100_s11, %s802_s16 }
  0x59   : > { %p799_p11 = pnand %p797_p9, %p783_p12  ;;  %p805_p4 = scmp.lt.s32.totalorder %s803_s7, %s796_s15 }
  0x5b   : > { %p800_p0 = pneg %p799_p11  ;;  %p806_p13 = por %p805_p4, %p804_p7 }
  0x5d   : > { %p807_p6 = pnand %p806_p13, %p800_p0 }
  0x5f   : > { %810 = shalt.err (!%p807_p6)
}
  0x60   : > { %s1232_s14 = smov 64   ;;  %257 = sbr.rel (%p993_p8) target bundleno = 526 (0x20e), region = 40 }
  0x61   : > { %649 = dma.hbm_to_vmem [thread:$0]  (!%p1096_p2), %s1092_s9, 128, %s1100_s11, %s1102_s12, %s1232_s14, %s1232_s14, %s902_s6  }
  0x62   : > { %s1136_s24 = sand.u32 (!%p993_p8), 1, %s881_s19   ;;  %p1233_p7 = scmp.ne.s32.totalorder (!%p993_p8), %s1226_s28, 0 }
  0x63   : > { %s578_s27 = sshll.u32 (!%p993_p8), %s1136_s24, 3  ;;  %s260_s15 = scalar_lea.sflag (!%p993_p8), [#allocation3], %s1136_s24 }
  0x64   : > { %s263_s25 = scalar_lea.vmem (!%p993_p8), [#allocation2], %s578_s27 }
  0x67   : > { %864 = dma.done.wait (%p1233_p7), %s260_s15, 128  }
  0x68   : > { %866 = vsyncadd (%p1233_p7), %s260_s15, 4294967168  ;;  %p1234_p2 = scmp.ne.s32.totalorder %s1224_s26, 0 }
  0x6a   : > { %868 = dma.done.wait (%p1234_p2), [#allocation6], 640  }
  0x6b   : > { %870 = vsyncadd (%p1234_p2), [#allocation6], 4294966656  ;;  %v904_v0 = vmov 0.0   ;;  %vm905_vm0 = vmmov 0   ;;  %v716_v1 = vld [vmem:[#allocation5] sm:$0xff]   ;;  %v717_v2 = vld [vmem:[#allocation5 + $0x8] sm:$0xff]  }
  0x6c   : > { %615 = vmatprep.subr.bf16.mxu0 %v904_v0  ;;  %623 = vmatprep.mubr.msk.bf16.mxu0 %vm905_vm0, %v904_v0  ;;  %v718_v3 = vld [vmem:[#allocation5 + $0x10] sm:$0xff]   ;;  %v719_v4 = vld [vmem:[#allocation5 + $0x18] sm:$0xff]   ;;  %vm345_vm1 = vcmask 523264   ;;  %v602_v6 = vld [vmem:[#allocation7] sm:$0xff]   ;;  %s600_s9 = sshll.u32 %s889_s21, 7  ;;  %s297_s11 = scalar_lea.vmem [#allocation8], %s578_s27 }
  0x6d   : > { %616 = vmatpush3.bf16.msra.mxu0 %v716_v1  ;;  %v720_v5 = vld [vmem:[%s263_s25] sm:$0xff]   ;;  %v603_v7 = vunpack.c.l.bf16 %v602_v6  ;;  %v604_v8 = vunpack.c.h.bf16 %v602_v6  ;;  %s460_s12 = sshll.u32 %s297_s11, 4  ;;  %s1162_s7 = scalar_lea.hbm %s1218_s5, %s600_s9  ;;  %s1164_s12 = int_to_ptr.vmem [resolvable:$true] %s460_s12 }
  0x6e   : > { %617 = vmatprep.subr.bf16.mxu0 %v904_v0  ;;  %v588_v34 = vld [vmem:[%s1216_s3] ss:$0 sm:$0xff]  ;;  %s445_s14 = scalar_lea.sflag [#allocation4], %s1136_s24  ;;  %s811_s15 = scalar_lea.vmem %s1164_s12, 128 }
  0x6f   : > { %v589_v39 = vld [vmem:[%s1217_s4] ss:$0 sm:$0xff]  ;;  %p812_p8 = scmp.ne.s32.totalorder %s1164_s12, %s811_s15  ;;  %p1235_p12 = scmp.ne.s32.totalorder %s1230_s13, 0 }
  0x70   : > { %s906_s21 = smov [#allocation8]  }
  0x71   : > { %618 = vmatpush3.bf16.msra.mxu0 %v717_v2  ;;  %p813_p1 = pnand %p812_p8, %p1235_p12  ;;  %s815_s27 = sshll.u32 %s906_s21, 4  ;;  %s816_s27 = int_to_ptr.vmem [resolvable:$false] %s815_s27 }
  0x72   : > { %619 = vmatprep.subr.bf16.mxu0 %v904_v0  ;;  %s817_s25 = scalar_lea.vmem %s816_s27, 256  ;;  %p818_p3 = scmp.lt.s32.totalorder %s1164_s12, %s816_s27 }
  0x73   : > { %p814_p10 = pneg %p813_p1  ;;  %p819_p5 = scmp.lt.s32.totalorder %s817_s25, %s811_s15 }
  0x75   : > { %620 = vmatpush3.bf16.msra.mxu0 %v718_v3  ;;  %p820_p9 = por %p819_p5, %p818_p3 }
  0x76   : > { %621 = vmatprep.subr.bf16.mxu0 %v904_v0 }
  0x77   : > { %p821_p11 = pnand %p820_p9, %p814_p10 }
  0x79   : > { %622 = vmatpush3.bf16.msra.mxu0 %v719_v4 }
  0x7c   : > { %624 = vmatmul.mubr.msk.bf16.vlgmr.msra.gmra.mrb[0].mxu0 %vm345_vm1, %v720_v5 }
 0x14f   : > { %v383_v9 = vpop.f32.mrb[0].mxu0 }
 0x150   : > { %v384_v10 = vadd.f32 %v603_v7, %v383_v9  ;;  %v625_v11 = vpop.f32.mrb[1].mxu0 }
 0x151   : > { %v386_v12 = vpop.f32.mrb[2].mxu0 }
 0x152   : > { %v387_v13 = vadd.f32 %v604_v8, %v386_v12  ;;  %390 = vadd.xlane.f32.xlu0 %v384_v10  ;;  %v626_v14 = vpop.f32.mrb[3].mxu0  ;;  %v396_v15 = vmul.f32 %v384_v10, %v384_v10 }
 0x154   : > { %398 = vadd.xlane.f32.xlu1 %v396_v15  ;;  %v397_v16 = vmul.f32 %v387_v13, %v387_v13 }
 0x156   : > { %392 = vadd.xlane.f32.xlu0 %v387_v13 }
 0x158   : > { %400 = vadd.xlane.f32.xlu1 %v397_v16 }
 0x1df   : > { %v391_v17 = vpop.xlane.xlu0 %390 }
 0x1e0   : > { %v394_v18 = vmul.f32 0.03125, %v391_v17 }
 0x1e1   : > { %v399_v19 = vpop.xlane.xlu1 %398 }
 0x1e2   : > { %v404_v20 = vmul.f32 %v394_v18, %v394_v18  ;;  %v402_v21 = vmul.f32 0.03125, %v399_v19  ;;  %v408_v31 = vsub.f32 %v384_v10, %v394_v18 }
 0x1e3   : > { %v393_v22 = vpop.xlane.xlu0 %392 }
 0x1e4   : > { %v406_v23 = vsub.f32 %v402_v21, %v404_v20  ;;  %v395_v24 = vmul.f32 0.03125, %v393_v22 }
 0x1e5   : > { %v401_v25 = vpop.xlane.xlu1 %400 }
 0x1e6   : > { %v410_v26 = vadd.f32 1e-05, %v406_v23  ;;  %v405_v27 = vmul.f32 %v395_v24, %v395_v24  ;;  %v403_v28 = vmul.f32 0.03125, %v401_v25  ;;  %v409_v35 = vsub.f32 %v387_v13, %v395_v24 }
 0x1e8   : > { %721 = vrsqrt.f32 %v410_v26  ;;  %v407_v29 = vsub.f32 %v403_v28, %v405_v27 }
 0x1ea   : > { %v411_v30 = vadd.f32 1e-05, %v407_v29 }
 0x1ec   : > { %723 = vrsqrt.f32 %v411_v30 }
 0x1f2   : > { %v722_v32 = vpop.eup %721 }
 0x1f3   : > { %v414_v33 = vmul.f32 %v722_v32, %v408_v31 }
 0x1f5   : > { %v423_v37 = vmul.f32 %v588_v34, %v414_v33 }
 0x1f6   : > { %v724_v36 = vpop.eup %723 }
 0x1f7   : > { %v415_v38 = vmul.f32 %v724_v36, %v409_v35  ;;  %v432_v42 = vadd.f32 %v589_v39, %v423_v37 }
 0x1f9   : > { %v424_v40 = vmul.f32 %v588_v34, %v415_v38 }
 0x1fb   : > { %v433_v41 = vadd.f32 %v589_v39, %v424_v40 }
 0x1fd   : > { %v608_v43 = vpack.c.bf16 %v433_v41, %v432_v42 }
 0x1ff   : > { %609 = vst [vmem:[%s297_s11] sm:$0xff] %v608_v43  }
 0x200   : > { %824 = shalt.err (!%p821_p11)
}
 0x201   : > { %s825_s26 = scalar_lea.hbm %s1162_s7, 128  ;;  %s829_s6 = scalar_lea.hbm %s1218_s5, 256 }
 0x202   : > { %p826_p0 = scmp.ne.s32.totalorder %s1162_s7, %s825_s26  ;;  %p830_p6 = scmp.lt.u32.totalorder %s1162_s7, %s1218_s5 }
 0x203   : > { %p831_p7 = scmp.lt.u32.totalorder %s829_s6, %s825_s26  ;;  %p833_p8 = scmp.lt.u32.totalorder %s825_s26, %s1162_s7 }
 0x204   : > { %p827_p4 = pnand %p826_p0, %p1235_p12 }
 0x205   : > { %p832_p2 = por %p831_p7, %p830_p6 }
 0x206   : > { %p828_p13 = pneg %p827_p4 }
 0x207   : > { %p834_p1 = por %p833_p8, %p832_p2 }
 0x209   : > { %p835_p10 = pnand %p834_p1, %p828_p13 }
 0x20b   : > { %838 = shalt.err (!%p835_p10)
}
 0x20c   : > { %s907_s10 = smov 64   ;;  %s908_s16 = smov 4  }
 0x20d   : > { %637 = dma.vmem_to_hbm [thread:$0]  (%p1235_p12), %s1164_s12, 128, %s1162_s7, %s445_s14, %s907_s10, %s907_s10, %s908_s16  }
 0x20e PF: > { %s475_s15 = sand.u32 1, %s877_s18   ;;  %p1236_p3 = scmp.ne.s32.totalorder %s1227_s29, 0 }
 0x20f   : > { %p1237_p5 = scmp.ge.s32.totalorder %s897_s23, 2  ;;  %s476_s21 = scalar_lea.sflag [#allocation4], %s475_s15 }
 0x211   : > { %p651_p9 = pnand %p1237_p5, %p1236_p3 }
 0x213   : > { %872 = dma.done.wait (!%p651_p9), %s476_s21, 128  }
 0x214   : > { %874 = vsyncadd (!%p651_p9), %s476_s21, 4294967168  ;;  %s22_s23 = sadd.s32 1, %s897_s23   ;;  %s1238_s18 = smov %s881_s19 }
 0x215   : > { %p19_p11 = scmp.ge.s32.totalorder %s22_s23, 4   ;;  %s1239_s19 = smov %s885_s20 }
 0x216   : > { %s1240_s20 = smov %s1087_s17  ;;  %s1241_s21 = smov %s893_s22 }
 0x217   : > { %s1242_s22 = smov %s1244_s8  ;;  %21 = sbr.rel (!%p19_p11) target bundleno = 7 (0x7), region = 94 }
 0x21e   :  { %481 = vsyncpa [#allocation3], 1 }
 0x21f   :  { %483 = vsyncpa [#allocation3 + $0x1], 1 }
 0x220   :  { %484 = vsyncpa [#allocation6], 1 }
 0x221   :  { %485 = vsyncpa [#allocation4], 1 }
 0x222   :  { %487 = vsyncpa [#allocation4 + $0x1], 1 }

</bundles_post_ra>
